<compile_context>
chip_gen: v7x
topology: tpu7x:2x2x1
jax: 0.10.0
libtpu: 0.0.40
codegen_flags: <defaults>
</compile_context>

<pallas_src>
import jax
import jax.numpy as jnp
from jax import lax
from jax.experimental import pallas as pl
from jax.experimental.pallas import tpu as pltpu


# Vocab sizes up to this use the MXU one-hot-matmul gather (exact for a 0/1
# one-hot in f32); larger vocabs use a vectorized gather on the resident table.
_ONE_HOT_MAX_VOCAB = 2048
# Below this much output data, kernel launch overhead dominates; use XLA gather.
_MIN_KERNEL_OUTPUT_BYTES = 64 << 10


def _round_up(x: int, m: int) -> int:
    return ((x + m - 1) // m) * m


def _vmem_capacity_bytes() -> int:
    """Physical VMEM per TensorCore; conservative 64 MiB if the query fails."""
    try:
        cap = getattr(pltpu.get_tpu_info(), "vmem_capacity_bytes", None)
        if cap:
            return int(cap)
    except Exception:
        pass
    return 64 << 20  # v7x per-TC size == safe lower bound across generations


def _make_gather_kernel(use_onehot: bool):
    def kernel(idx_ref, table_hbm_ref, out_ref, table_vmem_ref):
        # idx_ref       : VMEM (t_blk, 1) int32   -- this step's token indices.
        # table_hbm_ref : HBM  (vocab, dims)      -- untiled (memory_space=ANY).
        # out_ref       : VMEM (t_blk, dims)      -- dense output tile.
        # table_vmem_ref: VMEM (vocab, dims)      -- single-buffered resident copy.

        # One-time HBM -> VMEM copy of the full table.  Scratch persists across
        # grid steps and is never double-buffered.  Correct because the grid
        # runs sequentially on a single core ("arbitrary" semantics below).
        @pl.when(pl.program_id(0) == 0)
        def _():
            pltpu.sync_copy(table_hbm_ref, table_vmem_ref)

        idx = idx_ref[...]                 # (t_blk, 1) int32
        table = table_vmem_ref[...]        # (vocab, dims)
        t_blk = idx.shape[0]
        vocab = table.shape[0]

        if use_onehot:
            # Vectorized gather as a one-hot matmul on the MXU.  idx is
            # (t_blk, 1) so the comparison is a cheap lane-broadcast against a
            # lane-axis iota; exact for 0/1 one-hot in f32.
            col = lax.broadcasted_iota(jnp.int32, (t_blk, vocab), 1)
            one_hot = (idx == col).astype(table.dtype)
            rows = jnp.dot(one_hot, table, preferred_element_type=jnp.float32)
        else:
            # Large vocab: vectorized gather along the sublane axis of the
            # VMEM-resident table (single dense tile produced per step).
            rows = jnp.take(table, idx[:, 0], axis=0)

        out_ref[...] = rows.astype(out_ref.dtype)

    return kernel


def pretrained_avg_vectorizer_forward(averages: jax.Array,
                                      indices: jax.Array,
                                      *,
                                      block_tokens: int = 1024,
                                      force_kernel: bool = False) -> jax.Array:
    """Equivalent of `PretrainedAvgVectorizer.forward` (== averages[indices])."""
    batch, seq = indices.shape
    vocab, dims = averages.shape
    n = batch * seq
    itemsize = jnp.dtype(averages.dtype).itemsize

    # Index hygiene: torch advanced indexing wraps negatives and raises on OOB.
    # We wrap negatives for parity and clamp anything else (no OOB VMEM access
    # can be generated; true OOB detection is left to the caller).
    flat_idx = indices.reshape(-1).astype(jnp.int32)
    flat_idx = jnp.where(flat_idx < 0, flat_idx + vocab, flat_idx)
    flat_idx = jnp.clip(flat_idx, 0, vocab - 1)

    table_bytes = vocab * dims * itemsize
    out_bytes = n * dims * itemsize

    # Token block size: multiple of 8 sublanes; default 1024 amortizes the
    # ~0.35 us per-grid-step fixed cost (sweep 1024-4096 for production shapes).
    t_blk = max(8, min(int(block_tokens), _round_up(n, 8)))
    t_blk = _round_up(t_blk, 8)
    n_blocks = -(-n // t_blk)
    n_pad = n_blocks * t_blk

    use_onehot = vocab <= _ONE_HOT_MAX_VOCAB

    # --- VMEM budget, derived from the chip's actual capacity ---------------
    # single-buffered table scratch + double-buffered idx/out blocks + the
    # in-kernel one-hot intermediate + slack for compiler-internal scratch.
    out_blk_bytes = t_blk * dims * itemsize
    idx_blk_bytes = t_blk * 128 * 4                       # (t_blk,1) i32, lane-padded tiles
    onehot_bytes = t_blk * _round_up(vocab, 128) * 4 if use_onehot else 0
    slack = max(4 << 20, table_bytes // 8)
    overhead = 2 * out_blk_bytes + 2 * idx_blk_bytes + onehot_bytes + slack

    vmem_cap = _vmem_capacity_bytes()
    vmem_budget = int(0.9 * vmem_cap)                     # headroom vs physical VMEM
    fits_resident = (table_bytes + overhead) <= vmem_budget

    if not fits_resident:
        # TODO(synk): streamed large-table path (data-dependent per-row
        # BlockSpec with scalar-prefetched indices, or manual double-buffered
        # row DMA) for tables that do not fit VMEM; XLA gather used instead.
        return jnp.take(averages, flat_idx, axis=0).reshape(batch, seq, dims)
    if not force_kernel and out_bytes < _MIN_KERNEL_OUTPUT_BYTES:
        return jnp.take(averages, flat_idx, axis=0).reshape(batch, seq, dims)

    if n_pad > n:
        flat_idx = jnp.pad(flat_idx, (0, n_pad - n))      # pad with valid index 0
    idx_2d = flat_idx.reshape(n_pad, 1)                   # blocked VMEM input, O(t_blk) on chip

    vmem_limit = int(min(vmem_budget, max(16 << 20, table_bytes + overhead)))

    out_flat = pl.pallas_call(
        _make_gather_kernel(use_onehot),
        grid=(n_blocks,),
        in_specs=[
            pl.BlockSpec((t_blk, 1), lambda i: (i, 0)),   # per-step index block
            pl.BlockSpec(memory_space=pl.ANY),            # table: raw HBM ref, copied once
        ],
        out_specs=pl.BlockSpec((t_blk, dims), lambda i: (i, 0)),
        out_shape=jax.ShapeDtypeStruct((n_pad, dims), averages.dtype),
        scratch_shapes=[pltpu.VMEM((vocab, dims), averages.dtype)],
        compiler_params=pltpu.CompilerParams(
            # "arbitrary": the grid runs sequentially on one core, so the
            # program_id==0 table copy is visible to every step and the table
            # is DMA'd from HBM exactly once (not once per TensorCore on v7x).
            dimension_semantics=("arbitrary",),
            vmem_limit_bytes=vmem_limit,
        ),
    )(idx_2d, averages)

    return out_flat[:n].reshape(batch, seq, dims)


if __name__ == "__main__":
    key = jax.random.PRNGKey(0)
    k_table, k_idx = jax.random.split(key)

    # Small shapes implied by the module: vocab-sized table of `dims`-wide
    # averages, (batch, seq) index tensor.
    vocab, dims = 16, 32
    batch, seq = 2, 8

    # Deterministic synthetic "pretrained" averages (the real module fills
    # these via TorchAveragingPretrainer; here we just initialize them).
    averages = jax.random.normal(k_table, (vocab, dims), dtype=jnp.float32)
    indices = jax.random.randint(k_idx, (batch, seq), 0, vocab, dtype=jnp.int32)

    # force_kernel=True so the Pallas path is exercised even at demo sizes
    # (production dispatch would use the XLA gather for inputs this small).
    out = pretrained_avg_vectorizer_forward(averages, indices, force_kernel=True)
    out = jax.block_until_ready(out)

    ref = jnp.take(averages, indices.reshape(-1), axis=0).reshape(batch, seq, dims)
    assert out.shape == (batch, seq, dims), out.shape
    assert out.dtype == jnp.float32
    assert bool(jnp.allclose(out, ref, atol=1e-6)), "Pallas gather mismatch vs reference"

    # Second config: multi-block grid, token padding, and reuse of the resident
    # table across grid steps (table copied only at program_id == 0).
    batch2, seq2 = 4, 40
    indices2 = jax.random.randint(jax.random.fold_in(k_idx, 1),
                                  (batch2, seq2), 0, vocab, dtype=jnp.int32)
    out2 = pretrained_avg_vectorizer_forward(averages, indices2,
                                             block_tokens=64, force_kernel=True)
    out2 = jax.block_until_ready(out2)
    ref2 = jnp.take(averages, indices2.reshape(-1), axis=0).reshape(batch2, seq2, dims)
    assert bool(jnp.allclose(out2, ref2, atol=1e-6)), "multi-block Pallas gather mismatch"

    # TODO(synk): pretraining-time state updates (TorchAveragingPretrainer
    # sums/counts accumulation and close()) are host-side bookkeeping, not part
    # of forward, and are not implemented as a kernel.
    print("KERNEL_OK")
</pallas_src>

<mosaic_0001>
module attributes {stable_mosaic.version = 11 : i64} {
  func.func @kernel(%arg0: i32, %arg1: memref<16x1xi32, #tpu.memory_space<vmem>>, %arg2: memref<16x32xf32, #tpu.memory_space<any>>, %arg3: memref<16x32xf32, #tpu.memory_space<vmem>>, %arg4: memref<16x32xf32, #tpu.memory_space<vmem>>) attributes {dimension_semantics = [#tpu.dimension_semantics<arbitrary>], iteration_bounds = array<i64: 1>, scalar_prefetch = 0 : i64, scratch_operands = 1 : i64, tpu.core_type = #tpu.core_type<tc>, window_params = [{transform_indices = @transform_0, window_bounds = array<i64: 16, 1>}, {}, {transform_indices = @transform_2, window_bounds = array<i64: 16, 32>}]} {
    %c0_i32 = arith.constant 0 : i32
    %0 = arith.cmpi eq, %arg0, %c0_i32 : i32
    %1 = arith.extui %0 : i1 to i32
    %c0_i32_0 = arith.constant 0 : i32
    %2 = arith.cmpi ne, %1, %c0_i32_0 : i32
    scf.if %2 {
      "tpu.region"() ({
        %12 = tpu.sem_alloc : memref<!tpu.dma_semaphore, #tpu.memory_space<semaphore_mem>>
        tpu.enqueue_dma source(%arg2 : memref<16x32xf32, #tpu.memory_space<any>>) target(%arg4 : memref<16x32xf32, #tpu.memory_space<vmem>>) target_semaphore(%12 : memref<!tpu.dma_semaphore, #tpu.memory_space<semaphore_mem>>)
        tpu.wait_dma2 semaphore(%12 : memref<!tpu.dma_semaphore, #tpu.memory_space<semaphore_mem>>) src(%arg2 : memref<16x32xf32, #tpu.memory_space<any>>) dst(%arg4 : memref<16x32xf32, #tpu.memory_space<vmem>>)
        tpu.yield
      }) : () -> ()
    } else {
    }
    %c0 = arith.constant 0 : index
    %c0_1 = arith.constant 0 : index
    %3 = vector.load %arg1[%c0, %c0_1] : memref<16x1xi32, #tpu.memory_space<vmem>>, vector<16x1xi32>
    %c0_2 = arith.constant 0 : index
    %c0_3 = arith.constant 0 : index
    %4 = vector.load %arg4[%c0_2, %c0_3] : memref<16x32xf32, #tpu.memory_space<vmem>>, vector<16x32xf32>
    %5 = tpu.iota {dimensions = array<i32: 1>} : vector<16x16xi32>
    %6 = vector.broadcast %3 : vector<16x1xi32> to vector<16x16xi32>
    %7 = arith.cmpi eq, %6, %5 : vector<16x16xi32>
    %8 = arith.extui %7 : vector<16x16xi1> to vector<16x16xi32>
    %9 = arith.sitofp %8 : vector<16x16xi32> to vector<16x16xf32>
    %cst = arith.constant dense<0.000000e+00> : vector<16x32xf32>
    %10 = tpu.matmul %9, %4, %cst {dimension_numbers = #tpu.dot_dimension_numbers<[1], [0], [0], [1], [0, 0, 1, 1], [], []>} : vector<16x16xf32>, vector<16x32xf32>, vector<16x32xf32> -> vector<16x32xf32>
    %c0_4 = arith.constant 0 : index
    %c0_5 = arith.constant 0 : index
    %11 = vector.load %arg3[%c0_4, %c0_5] : memref<16x32xf32, #tpu.memory_space<vmem>>, vector<16x32xf32>
    tpu.vector_store %arg3[%c0_4, %c0_5], %10 {strides = array<i32>} : memref<16x32xf32, #tpu.memory_space<vmem>>, vector<16x32xf32>,
    return
  }
  func.func @transform_0(%arg0: i32) -> (i32, i32) {
    %c0_i32 = arith.constant 0 : i32
    %c0_i32_0 = arith.constant 0 : i32
    return %arg0, %c0_i32 : i32, i32
  }
  func.func @transform_2(%arg0: i32) -> (i32, i32) {
    %c0_i32 = arith.constant 0 : i32
    %c0_i32_0 = arith.constant 0 : i32
    return %arg0, %c0_i32 : i32, i32
  }
}

</mosaic_0001>

<bundles_post_ra>
// kernel: tpu_custom_call.1
= control target key start
LH: loop header
LB: loop body
LE: loop exit
PB: predicated region body
PF: predicated region fallthrough
CT: control target
= control target key end

     0   :  { %7 = vsyncpa [#allocation4], 0  ;;  %s283_s0 = inlined_call_operand.vmem [shape: s32[16,1], index: 0, kind: input, shape index: {}]   ;;  %s284_s1 = inlined_call_operand.vmem [shape: f32[16,32], index: 1, kind: input, shape index: {}]   ;;  %s285_s2 = inlined_call_operand.hbm [shape: f32[16,32], index: 2, kind: output, shape index: {}]  }
   0x1   :  { %v46_v0 = vld [vmem:[%s284_s1] sm:$0xff]  ;;  %v48_v1 = vld [vmem:[%s284_s1 + $0x8] sm:$0xff] }
   0x2   :  { %57 = vsyncadd [#allocation5], 256 }
   0x3   :  { %235 = dma.done.wait [#allocation5], 256 }
   0x4   :  { %236 = vsyncadd [#allocation5], 4294967040  ;;  %v61_v2 = vld [vmem:[%s283_s0] sm:$0xff]  ;;  %v239_v3 = vmov 0   ;;  %v203_v4 = vpack.c.bf16 %v48_v1, %v46_v0  ;;  %v62_v5 = vld [vmem:[%s283_s0 + $0x8] sm:$0xff]  ;;  %v65_v6 = vlaneseq  ;;  %vm79_vm0 = vcmask 130048  }
   0x5   :  { %212 = vset.pattern.permute.xlu0 %v239_v3  ;;  %v240_v9 = vmov 0.0   ;;  %s241_s1 = smov [#allocation3]   ;;  %vm161_vm3 = vcmask 261120  }
   0x6   :  { %68 = vperm.xlu0 %212, %v61_v2   ;;  %204 = vmatprep.subr.bf16.mxu0 %v203_v4  ;;  %v66_v7 = vand.u32 127, %v65_v6  ;;  %s169_s17 = sshll.u32 %s241_s1, 4  ;;  %s170_s17 = int_to_ptr.vmem [resolvable:$true] %s169_s17 }
   0x7   :  { %206 = vmatpush3.bf16.msra.mxu0 %v203_v4  ;;  %s213_s0 = scalar_lea.vmem %s170_s17, 256  ;;  %p218_p1 = scmp.lt.s32.totalorder %s170_s17, %s170_s17 }
   0x8   :  { %p214_p0 = scmp.ne.s32.totalorder %s170_s17, %s213_s0  ;;  %p219_p2 = scmp.lt.s32.totalorder %s213_s0, %s213_s0 }
   0xa   :  { %71 = vperm.xlu0 %212, %v62_v5   ;;  %p220_p3 = por %p219_p2, %p218_p1 }
   0xc   :  { %p221_p4 = pnand %p220_p3, %p214_p0 }
  0x85   :  { %v69_v8 = vpop.permute.xlu0 %68 }
  0x86   :  { %vm73_vm1 = vcmp.eq.s32.totalorder %v69_v8, %v66_v7 }
  0x87   :  { %v188_v10 = vsel %vm73_vm1, 1.0, %v240_v9 }
  0x88   :  { %200 = vmatprep.mubr.msk.f32.mxu0 %vm79_vm0, %v188_v10 }
  0x89   :  { %v72_v11 = vpop.permute.xlu0 %71 }
  0x8a   :  { %vm74_vm2 = vcmp.eq.s32.totalorder %v72_v11, %v66_v7 }
  0x8b   :  { %v189_v12 = vsel %vm74_vm2, 1.0, %v240_v9 }
  0x8c   :  { %201 = vmatmul.mubr.msk.f32.vlgmr.msra.gmra.mrb[0].mxu0 %vm79_vm0, %v189_v12 }
 0x15f   :  { %v202_v13 = vpop.f32.mrb[0].mxu0 }
 0x160   :  { %163 = vst.msk [vmem:[#allocation3 + $0x8] sm:$0xff] %vm161_vm3, %v202_v13  ;;  %v152_v14 = vpop.f32.mrb[1].mxu0 }
 0x161   :  { %162 = vst.msk [vmem:[#allocation3] sm:$0xff] %vm161_vm3, %v152_v14 }
 0x162   :  { %224 = shalt.err (!%p221_p4)
}
 0x163   :  { %s225_s20 = scalar_lea.hbm %s285_s2, 256 }
 0x164   :  { %p226_p5 = scmp.ne.s32.totalorder %s285_s2, %s225_s20  ;;  %p229_p6 = scmp.lt.u32.totalorder %s225_s20, %s285_s2 }
 0x166   :  { %p231_p7 = pnand %p229_p6, %p226_p5 }
 0x168   :  { %234 = shalt.err (!%p231_p7)
}
 0x169   :  { %s242_s25 = smov 128   ;;  %s243_s26 = smov 8  }
 0x16a   :  { %175 = dma.vmem_to_hbm [thread:$0]  %s170_s17, 256, %s285_s2, [#allocation4], %s242_s25, %s242_s25, %s243_s26  }
 0x16b   :  { %237 = dma.done.wait [#allocation4], 256  }
 0x16c   :  { %238 = vsyncadd [#allocation4], 4294967040 }
 0x16d   :  { %179 = vsyncpa [#allocation4], 1 }

</bundles_post_ra>
